<compile_context>
chip_gen: v7x
topology: tpu7x:2x2x1
jax: 0.10.0
libtpu: 0.0.40
codegen_flags: <defaults>
</compile_context>

<pallas_src>
import jax
import jax.numpy as jnp
from jax.experimental import pallas as pl
from jax.experimental.pallas import tpu as pltpu

IN_DIM   = 6          # `features` dim; net input dim = IN_DIM + 2 (r and 1/r appended)
HIDDEN   = 32
OUT_DIM  = 4
N_LAYERS = 3          # => 1 input linear, (N_LAYERS-1) hidden blocks, 1 output linear
BN_EPS   = 1e-5
BM_MAX   = 1024       # max batch tile on the lane axis (sweep 512..2048 if desired)


def _round_up(x: int, m: int) -> int:
    return ((x + m - 1) // m) * m


def _mlp_kernel(featT_ref, x1T_ref, x2T_ref, w0p_ref, whp_ref, wop_ref, outT_ref):
    # ---- fused _prep_input (batch on the lane axis) ----
    dr = x1T_ref[...] - x2T_ref[...]                       # (3, BM)
    r2 = jnp.sum(dr * dr, axis=0, keepdims=True)           # (1, BM)  sublane reduction
    r  = jnp.sqrt(r2)                                      # ||x1 - x2||
    ir = 1.0 / r                                           # matches PyTorch (inf if r == 0)

    # ---- Layer 0: Linear(in+2 -> H) + ReLU ----
    # The [features | r | 1/r] concat is expressed as a split matmul + two rank-1 updates,
    # so no in-kernel concatenation/relayout is needed.
    w0f  = w0p_ref[:, 0:IN_DIM]                            # (H, 6)
    w_r  = w0p_ref[:, IN_DIM:IN_DIM + 1]                   # (H, 1)  column for r
    w_ir = w0p_ref[:, IN_DIM + 1:IN_DIM + 2]               # (H, 1)  column for 1/r
    b0   = w0p_ref[:, IN_DIM + 2:IN_DIM + 3]               # (H, 1)
    h = jnp.dot(w0f, featT_ref[...], preferred_element_type=jnp.float32)   # (H, BM)
    h = h + w_r * r + w_ir * ir + b0
    h = jnp.maximum(h, 0.0)

    # ---- Hidden blocks: Linear -> BN(eval, folded) -> ReLU -> Dropout(identity) ----
    # TODO(synk): Dropout(p=0.3) and BatchNorm running-stat updates are train-mode stochastic /
    # stateful; eval-mode (identity dropout, folded BN affine) is implemented here.
    for i in range(N_LAYERS - 1):
        wh = whp_ref[i, :, 0:HIDDEN]                       # (H, H)  BN-folded W^T
        bh = whp_ref[i, :, HIDDEN:HIDDEN + 1]              # (H, 1)  BN-folded bias
        h = jnp.dot(wh, h, preferred_element_type=jnp.float32) + bh
        h = jnp.maximum(h, 0.0)

    # ---- Output linear (lane-dense store: (OUT_DIM, BM)) ----
    wo = wop_ref[:, 0:HIDDEN]                              # (OUT, H)
    bo = wop_ref[:, HIDDEN:HIDDEN + 1]                     # (OUT, 1)
    outT_ref[...] = jnp.dot(wo, h, preferred_element_type=jnp.float32) + bo


def nn_forward(features, x1, x2, params, *, bm_max=BM_MAX):
    """features: [B, IN_DIM], x1/x2: [B, 3]  ->  [B, OUT_DIM]"""
    w0p, whp, wop = params
    B = features.shape[0]

    # Batch tile: multiple of 128 lanes, capped at bm_max, and (when B allows it) sized so the
    # grid has >= 2 steps — keeps both v7x TensorCores busy; neutral on v5e/v6e.
    bm = min(bm_max, max(128, _round_up((B + 1) // 2, 128)))
    Bp = _round_up(B, bm)

    # Pad the batch to a tile multiple. x2 is padded with 1.0 (x1 with 0.0) so padded rows have
    # r > 0 and stay finite; their outputs are sliced away below.
    def pad_rows(a, val):
        return jnp.pad(a.astype(jnp.float32), ((0, Bp - B), (0, 0)), constant_values=val)

    featT = pad_rows(features, 0.0).T                      # (IN_DIM, Bp)
    x1T   = pad_rows(x1, 0.0).T                            # (3, Bp)
    x2T   = pad_rows(x2, 1.0).T                            # (3, Bp)

    grid = (Bp // bm,)
    outT = pl.pallas_call(
        _mlp_kernel,
        out_shape=jax.ShapeDtypeStruct((OUT_DIM, Bp), jnp.float32),
        grid=grid,
        in_specs=[
            pl.BlockSpec((IN_DIM, bm), lambda i: (0, i)),      # features^T, tiled over batch
            pl.BlockSpec((3, bm),      lambda i: (0, i)),      # x1^T
            pl.BlockSpec((3, bm),      lambda i: (0, i)),      # x2^T
            pl.BlockSpec(w0p.shape,    lambda i: (0, 0)),      # packed [W0^T | w_r | w_1/r | b0]
            pl.BlockSpec(whp.shape,    lambda i: (0, 0, 0)),   # packed [Wh^T(BN-folded) | bh]
            pl.BlockSpec(wop.shape,    lambda i: (0, 0)),      # packed [Wo^T | bo]
        ],
        out_specs=pl.BlockSpec((OUT_DIM, bm), lambda i: (0, i)),
        compiler_params=pltpu.CompilerParams(dimension_semantics=("parallel",)),
    )(featT, x1T, x2T, w0p, whp, wop)

    return outT[:, :B].T                                   # back to [B, OUT_DIM]


def init_params(key):
    """Deterministic init matching the PyTorch module: xavier_uniform_ Linear weights,
    PyTorch-default uniform biases, fresh BatchNorm1d state (gamma=1, beta=0, mean=0, var=1).
    Eval-mode BN is folded into the hidden linears; everything is packed into 3 slabs."""
    in_net = IN_DIM + 2
    L = N_LAYERS - 1
    ks = jax.random.split(key, 4 + 2 * L)

    def xavier_t(k, fan_in, fan_out):                      # W^T : (fan_out, fan_in)
        bound = (6.0 / (fan_in + fan_out)) ** 0.5
        return jax.random.uniform(k, (fan_out, fan_in), jnp.float32, -bound, bound)

    def bias_col(k, fan_in, fan_out):                      # b : (fan_out, 1)
        bound = 1.0 / (fan_in ** 0.5)
        return jax.random.uniform(k, (fan_out, 1), jnp.float32, -bound, bound)

    w0T = xavier_t(ks[0], in_net, HIDDEN)                  # (H, 8): cols 0:6 feat, 6 -> r, 7 -> 1/r
    b0  = bias_col(ks[1], in_net, HIDDEN)                  # (H, 1)
    whT = jnp.stack([xavier_t(ks[2 + i], HIDDEN, HIDDEN) for i in range(L)])      # (L, H, H)
    bh  = jnp.stack([bias_col(ks[2 + L + i], HIDDEN, HIDDEN) for i in range(L)])  # (L, H, 1)
    woT = xavier_t(ks[2 + 2 * L], HIDDEN, OUT_DIM)         # (OUT, H)
    bo  = bias_col(ks[3 + 2 * L], HIDDEN, OUT_DIM)         # (OUT, 1)

    # Fresh BatchNorm1d eval state, folded: y = sc*(W x + b) + sh = (sc*W) x + (sc*b + sh)
    gamma = jnp.ones((L, HIDDEN, 1), jnp.float32)
    beta  = jnp.zeros((L, HIDDEN, 1), jnp.float32)
    rmean = jnp.zeros((L, HIDDEN, 1), jnp.float32)
    rvar  = jnp.ones((L, HIDDEN, 1), jnp.float32)
    sc = gamma / jnp.sqrt(rvar + BN_EPS)
    sh = beta - rmean * sc
    whT_f = whT * sc                                       # scale rows of W^T
    bh_f  = bh * sc + sh

    # Pack weight+bias slabs (fewer pallas_call inputs / DMA streams).
    w0p = jnp.concatenate([w0T, b0], axis=1)               # (H, IN_DIM + 3)
    whp = jnp.concatenate([whT_f, bh_f], axis=2)           # (L, H, H + 1)
    wop = jnp.concatenate([woT, bo], axis=1)               # (OUT, H + 1)
    return (w0p, whp, wop)


def _reference(features, x1, x2, params):
    """Plain-JAX eval-mode reference (same packed params) for correctness checking."""
    w0p, whp, wop = params
    dr = x1 - x2
    r = jnp.sqrt(jnp.sum(dr * dr, axis=1, keepdims=True))
    x = jnp.concatenate([features, r, 1.0 / r], axis=1).astype(jnp.float32)
    h = jnp.maximum(x @ w0p[:, :IN_DIM + 2].T + w0p[:, IN_DIM + 2], 0.0)
    for i in range(N_LAYERS - 1):
        h = jnp.maximum(h @ whp[i, :, :HIDDEN].T + whp[i, :, HIDDEN], 0.0)
    return h @ wop[:, :HIDDEN].T + wop[:, HIDDEN]


if __name__ == "__main__":
    key = jax.random.PRNGKey(0)
    kf, k1, k2, kp = jax.random.split(key, 4)
    B = 256
    features = jax.random.normal(kf, (B, IN_DIM), jnp.float32)
    x1 = jax.random.normal(k1, (B, 3), jnp.float32)
    x2 = jax.random.normal(k2, (B, 3), jnp.float32)
    params = init_params(kp)

    out = nn_forward(features, x1, x2, params)
    out = jax.block_until_ready(out)

    assert out.shape == (B, OUT_DIM) and out.dtype == jnp.float32
    assert bool(jnp.all(jnp.isfinite(out)))

    ref = jax.block_until_ready(_reference(features, x1, x2, params))
    assert bool(jnp.allclose(out, ref, rtol=5e-3, atol=5e-3)), "mismatch vs plain-JAX reference"

    print("KERNEL_OK")
</pallas_src>

<mosaic_0001>
module attributes {stable_mosaic.version = 11 : i64} {
  func.func @_mlp_kernel(%arg0: i32, %arg1: memref<6x128xf32, #tpu.memory_space<vmem>>, %arg2: memref<3x128xf32, #tpu.memory_space<vmem>>, %arg3: memref<3x128xf32, #tpu.memory_space<vmem>>, %arg4: memref<32x9xf32, #tpu.memory_space<vmem>>, %arg5: memref<2x32x33xf32, #tpu.memory_space<vmem>>, %arg6: memref<4x33xf32, #tpu.memory_space<vmem>>, %arg7: memref<4x128xf32, #tpu.memory_space<vmem>>) attributes {dimension_semantics = [#tpu.dimension_semantics<parallel>], iteration_bounds = array<i64: 2>, scalar_prefetch = 0 : i64, scratch_operands = 0 : i64, tpu.core_type = #tpu.core_type<tc>, window_params = [{transform_indices = @transform_0, window_bounds = array<i64: 6, 128>}, {transform_indices = @transform_1, window_bounds = array<i64: 3, 128>}, {transform_indices = @transform_2, window_bounds = array<i64: 3, 128>}, {pipeline_mode = #tpu.pipeline_mode<synchronous>, transform_indices = @transform_3, window_bounds = array<i64: 32, 9>}, {pipeline_mode = #tpu.pipeline_mode<synchronous>, transform_indices = @transform_4, window_bounds = array<i64: 2, 32, 33>}, {pipeline_mode = #tpu.pipeline_mode<synchronous>, transform_indices = @transform_5, window_bounds = array<i64: 4, 33>}, {transform_indices = @transform_6, window_bounds = array<i64: 4, 128>}]} {
    %c0 = arith.constant 0 : index
    %c0_0 = arith.constant 0 : index
    %0 = vector.load %arg2[%c0, %c0_0] : memref<3x128xf32, #tpu.memory_space<vmem>>, vector<3x128xf32>
    %c0_1 = arith.constant 0 : index
    %c0_2 = arith.constant 0 : index
    %1 = vector.load %arg3[%c0_1, %c0_2] : memref<3x128xf32, #tpu.memory_space<vmem>>, vector<3x128xf32>
    %2 = arith.subf %0, %1 : vector<3x128xf32>
    %3 = arith.mulf %2, %2 : vector<3x128xf32>
    %cst = arith.constant dense<0.000000e+00> : vector<128xf32>
    %4 = vector.multi_reduction <add>, %3, %cst [0] : vector<3x128xf32> to vector<128xf32>
    %5 = vector.shape_cast %4 : vector<128xf32> to vector<1x128xf32>
    %6 = math.sqrt %5 : vector<1x128xf32>
    %cst_3 = arith.constant 1.000000e+00 : f32
    %7 = vector.broadcast %cst_3 : f32 to vector<1x128xf32>
    %8 = arith.divf %7, %6 : vector<1x128xf32>
    %c0_4 = arith.constant 0 : index
    %c0_5 = arith.constant 0 : index
    %9 = vector.load %arg4[%c0_4, %c0_5] : memref<32x9xf32, #tpu.memory_space<vmem>>, vector<32x6xf32>
    %c0_6 = arith.constant 0 : index
    %c6 = arith.constant 6 : index
    %10 = vector.load %arg4[%c0_6, %c6] : memref<32x9xf32, #tpu.memory_space<vmem>>, vector<32x1xf32>
    %c0_7 = arith.constant 0 : index
    %c7 = arith.constant 7 : index
    %11 = vector.load %arg4[%c0_7, %c7] : memref<32x9xf32, #tpu.memory_space<vmem>>, vector<32x1xf32>
    %c0_8 = arith.constant 0 : index
    %c8 = arith.constant 8 : index
    %12 = vector.load %arg4[%c0_8, %c8] : memref<32x9xf32, #tpu.memory_space<vmem>>, vector<32x1xf32>
    %c0_9 = arith.constant 0 : index
    %c0_10 = arith.constant 0 : index
    %13 = vector.load %arg1[%c0_9, %c0_10] : memref<6x128xf32, #tpu.memory_space<vmem>>, vector<6x128xf32>
    %cst_11 = arith.constant dense<0.000000e+00> : vector<32x128xf32>
    %14 = tpu.matmul %9, %13, %cst_11 {dimension_numbers = #tpu.dot_dimension_numbers<[1], [0], [0], [1], [0, 0, 1, 1], [], []>} : vector<32x6xf32>, vector<6x128xf32>, vector<32x128xf32> -> vector<32x128xf32>
    %15 = vector.broadcast %10 : vector<32x1xf32> to vector<32x128xf32>
    %16 = vector.broadcast %6 : vector<1x128xf32> to vector<32x128xf32>
    %17 = arith.mulf %15, %16 : vector<32x128xf32>
    %18 = arith.addf %14, %17 : vector<32x128xf32>
    %19 = vector.broadcast %11 : vector<32x1xf32> to vector<32x128xf32>
    %20 = vector.broadcast %8 : vector<1x128xf32> to vector<32x128xf32>
    %21 = arith.mulf %19, %20 : vector<32x128xf32>
    %22 = arith.addf %18, %21 : vector<32x128xf32>
    %23 = vector.broadcast %12 : vector<32x1xf32> to vector<32x128xf32>
    %24 = arith.addf %22, %23 : vector<32x128xf32>
    %cst_12 = arith.constant 0.000000e+00 : f32
    %25 = vector.broadcast %cst_12 : f32 to vector<32x128xf32>
    %26 = arith.maximumf %24, %25 : vector<32x128xf32>
    %c0_13 = arith.constant 0 : index
    %c0_14 = arith.constant 0 : index
    %c0_15 = arith.constant 0 : index
    %27 = vector.load %arg5[%c0_13, %c0_14, %c0_15] : memref<2x32x33xf32, #tpu.memory_space<vmem>>, vector<1x32x32xf32>
    %28 = vector.shape_cast %27 : vector<1x32x32xf32> to vector<32x32xf32>
    %c0_16 = arith.constant 0 : index
    %c0_17 = arith.constant 0 : index
    %c32 = arith.constant 32 : index
    %29 = vector.load %arg5[%c0_16, %c0_17, %c32] : memref<2x32x33xf32, #tpu.memory_space<vmem>>, vector<1x32x1xf32>
    %30 = vector.shape_cast %29 : vector<1x32x1xf32> to vector<32x1xf32>
    %cst_18 = arith.constant dense<0.000000e+00> : vector<32x128xf32>
    %31 = tpu.matmul %28, %26, %cst_18 {dimension_numbers = #tpu.dot_dimension_numbers<[1], [0], [0], [1], [0, 0, 1, 1], [], []>} : vector<32x32xf32>, vector<32x128xf32>, vector<32x128xf32> -> vector<32x128xf32>
    %32 = vector.broadcast %30 : vector<32x1xf32> to vector<32x128xf32>
    %33 = arith.addf %31, %32 : vector<32x128xf32>
    %cst_19 = arith.constant 0.000000e+00 : f32
    %34 = vector.broadcast %cst_19 : f32 to vector<32x128xf32>
    %35 = arith.maximumf %33, %34 : vector<32x128xf32>
    %c1 = arith.constant 1 : index
    %c0_20 = arith.constant 0 : index
    %c0_21 = arith.constant 0 : index
    %36 = vector.load %arg5[%c1, %c0_20, %c0_21] : memref<2x32x33xf32, #tpu.memory_space<vmem>>, vector<1x32x32xf32>
    %37 = vector.shape_cast %36 : vector<1x32x32xf32> to vector<32x32xf32>
    %c1_22 = arith.constant 1 : index
    %c0_23 = arith.constant 0 : index
    %c32_24 = arith.constant 32 : index
    %38 = vector.load %arg5[%c1_22, %c0_23, %c32_24] : memref<2x32x33xf32, #tpu.memory_space<vmem>>, vector<1x32x1xf32>
    %39 = vector.shape_cast %38 : vector<1x32x1xf32> to vector<32x1xf32>
    %cst_25 = arith.constant dense<0.000000e+00> : vector<32x128xf32>
    %40 = tpu.matmul %37, %35, %cst_25 {dimension_numbers = #tpu.dot_dimension_numbers<[1], [0], [0], [1], [0, 0, 1, 1], [], []>} : vector<32x32xf32>, vector<32x128xf32>, vector<32x128xf32> -> vector<32x128xf32>
    %41 = vector.broadcast %39 : vector<32x1xf32> to vector<32x128xf32>
    %42 = arith.addf %40, %41 : vector<32x128xf32>
    %cst_26 = arith.constant 0.000000e+00 : f32
    %43 = vector.broadcast %cst_26 : f32 to vector<32x128xf32>
    %44 = arith.maximumf %42, %43 : vector<32x128xf32>
    %c0_27 = arith.constant 0 : index
    %c0_28 = arith.constant 0 : index
    %45 = vector.load %arg6[%c0_27, %c0_28] : memref<4x33xf32, #tpu.memory_space<vmem>>, vector<4x32xf32>
    %c0_29 = arith.constant 0 : index
    %c32_30 = arith.constant 32 : index
    %46 = vector.load %arg6[%c0_29, %c32_30] : memref<4x33xf32, #tpu.memory_space<vmem>>, vector<4x1xf32>
    %cst_31 = arith.constant dense<0.000000e+00> : vector<4x128xf32>
    %47 = tpu.matmul %45, %44, %cst_31 {dimension_numbers = #tpu.dot_dimension_numbers<[1], [0], [0], [1], [0, 0, 1, 1], [], []>} : vector<4x32xf32>, vector<32x128xf32>, vector<4x128xf32> -> vector<4x128xf32>
    %48 = vector.broadcast %46 : vector<4x1xf32> to vector<4x128xf32>
    %49 = arith.addf %47, %48 : vector<4x128xf32>
    %c0_32 = arith.constant 0 : index
    %c0_33 = arith.constant 0 : index
    %50 = vector.load %arg7[%c0_32, %c0_33] : memref<4x128xf32, #tpu.memory_space<vmem>>, vector<4x128xf32>
    tpu.vector_store %arg7[%c0_32, %c0_33], %49 {strides = array<i32>} : memref<4x128xf32, #tpu.memory_space<vmem>>, vector<4x128xf32>,
    return
  }
  func.func @transform_0(%arg0: i32) -> (i32, i32) {
    %c0_i32 = arith.constant 0 : i32
    %c0_i32_0 = arith.constant 0 : i32
    return %c0_i32, %arg0 : i32, i32
  }
  func.func @transform_1(%arg0: i32) -> (i32, i32) {
    %c0_i32 = arith.constant 0 : i32
    %c0_i32_0 = arith.constant 0 : i32
    return %c0_i32, %arg0 : i32, i32
  }
  func.func @transform_2(%arg0: i32) -> (i32, i32) {
    %c0_i32 = arith.constant 0 : i32
    %c0_i32_0 = arith.constant 0 : i32
    return %c0_i32, %arg0 : i32, i32
  }
  func.func @transform_3(%arg0: i32) -> (i32, i32) {
    %c0_i32 = arith.constant 0 : i32
    %c0_i32_0 = arith.constant 0 : i32
    %c0_i32_1 = arith.constant 0 : i32
    return %c0_i32, %c0_i32_0 : i32, i32
  }
  func.func @transform_4(%arg0: i32) -> (i32, i32, i32) {
    %c0_i32 = arith.constant 0 : i32
    %c0_i32_0 = arith.constant 0 : i32
    %c0_i32_1 = arith.constant 0 : i32
    %c0_i32_2 = arith.constant 0 : i32
    return %c0_i32, %c0_i32_0, %c0_i32_1 : i32, i32, i32
  }
  func.func @transform_5(%arg0: i32) -> (i32, i32) {
    %c0_i32 = arith.constant 0 : i32
    %c0_i32_0 = arith.constant 0 : i32
    %c0_i32_1 = arith.constant 0 : i32
    return %c0_i32, %c0_i32_0 : i32, i32
  }
  func.func @transform_6(%arg0: i32) -> (i32, i32) {
    %c0_i32 = arith.constant 0 : i32
    %c0_i32_0 = arith.constant 0 : i32
    return %c0_i32, %arg0 : i32, i32
  }
}

</mosaic_0001>

<bundles_post_ra>
// kernel: tpu_custom_call.1
= control target key start
LH: loop header
LB: loop body
LE: loop exit
PB: predicated region body
PF: predicated region fallthrough
CT: control target
= control target key end

     0   :  { %11 = vsyncpa [#allocation3], 0  ;;  %s1458_s0 = inlined_call_operand.vmem [shape: f32[6,256], index: 0, kind: input, shape index: {}]   ;;  %s1459_s1 = inlined_call_operand.vmem [shape: f32[3,256], index: 1, kind: input, shape index: {}]   ;;  %s1460_s2 = inlined_call_operand.vmem [shape: f32[3,256], index: 2, kind: input, shape index: {}]   ;;  %s1461_s3 = inlined_call_operand.vmem [shape: f32[32,9], index: 3, kind: input, shape index: {}]   ;;  %s1462_s4 = inlined_call_operand.hbm [shape: f32[2,32,33], index: 4, kind: input, shape index: {}]   ;;  %s1463_s5 = inlined_call_operand.vmem [shape: f32[4,33], index: 5, kind: input, shape index: {}]   ;;  %s1464_s6 = inlined_call_operand.hbm [shape: f32[4,256], index: 6, kind: output, shape index: {}]  }
   0x1   :  { %12 = vsyncpa [#allocation4], 0 }
   0x2   :  { %14 = vsyncpa [#allocation4 + $0x1], 0  ;;  %s1261_s21 = smov 0   ;;  %s1263_s22 = smov 0  }
   0x3   :  { %s1265_s23 = smov 0   ;;  %s1267_s24 = smov 0  }
   0x4 LB: > { %s1282_s25 = sadd.s32 4294967295, %s1213_s24   ;;  %s924_s26 = sadd.s32 4294967294, %s1213_s24   ;;  %s1213_s24 = sphi %s1267_s24, %s1480_s24   ;;  %s1209_s23 = sphi %s1265_s23, %s1479_s23   ;;  %s1205_s22 = sphi %s1263_s22, %s1478_s22   ;;  %s1201_s21 = sphi %s1261_s21, %s1477_s21  }
   0x5   : > { %s1286_s27 = sadd.s32 1, %s1213_s24   ;;  %s168_s28 = sadd.s32 1, %s1209_s23 }
   0x6   : > { %s165_s29 = ssub.s32 %s1213_s24, %s1286_s27  ;;  %p178_p0 = scmp.ne.s32.totalorder %s1209_s23, %s1205_s22 }
   0x7   : > { %p166_p1 = scmp.eq.s32.totalorder %s165_s29, 0  ;;  %p179_p2 = scmp.eq.s32.totalorder %s1282_s25, 1 }
   0x8   : > { %p184_p3 = scmp.ne.s32.totalorder %s1205_s22, %s1201_s21  ;;  %p185_p4 = scmp.eq.s32.totalorder %s924_s26, 1 }
   0x9   : > { %s1297_s30 = scalar_select %p166_p1, %s1209_s23, %s168_s28  }
   0xa   : > { %p1299_p5 = por %p179_p2, %p178_p0  ;;  %p1303_p6 = por %p185_p4, %p184_p3 }
   0xb   : > { %p925_p7 = scmp.ge.s32.totalorder %s1213_s24, 1  ;;  %p192_p8 = scmp.lt.s32.totalorder %s1213_s24, 3 }
   0xc   : > { %s1468_s7 = scalar_select %p1299_p5, 1, 0 }
   0xd   : > { %s1469_s8 = scalar_select %p1303_p6, 1, 0 }
   0xe   : > { %p1465_p9 = scmp.eq.s32.totalorder %s1282_s25, 0  ;;  %p1310_p10 = pnand %p925_p7, %p192_p8 }
   0xf   : > { %s1215_s10 = smov [#allocation2]   ;;  %s1119_s15 = scalar_lea.hbm %s1462_s4, 1024 }
  0x10   : > { %s1470_s9 = scalar_select %p1310_p10, 1, 0 }
  0x11   : > { %s207_s11 = sshll.u32 %s1215_s10, 4  ;;  %p1053_p11 = pneg %p1310_p10  ;;  %s208_s11 = int_to_ptr.vmem [resolvable:$true] %s207_s11 }
  0x12   : > { %p1120_p13 = scmp.ne.s32.totalorder %s1462_s4, %s1119_s15  ;;  %p1126_p3 = scmp.lt.u32.totalorder %s1119_s15, %s1462_s4 }
  0x13   : > { %p1318_p12 = pnand %p1465_p9, %p1053_p11 }
  0x15   : > { %p1121_p0 = pneg %p1318_p12 }
  0x17   : > { %p1122_p1 = pnand %p1121_p0, %p1120_p13 }
  0x19   : > { %p1123_p2 = pneg %p1122_p1 }
  0x1b   : > { %p1128_p4 = pnand %p1126_p3, %p1123_p2 }
  0x1d   : > { %1131 = shalt.err (!%p1128_p4)
}
  0x1e   : > { %s1132_s20 = scalar_lea.vmem %s208_s11, 1024  ;;  %p1140_p9 = scmp.lt.s32.totalorder %s208_s11, %s208_s11 }
  0x1f   : > { %p1133_p7 = scmp.ne.s32.totalorder %s208_s11, %s1132_s20  ;;  %p1141_p6 = scmp.lt.s32.totalorder %s1132_s20, %s1132_s20 }
  0x21   : > { %p1135_p8 = pnand %p1133_p7, %p1121_p0  ;;  %p1142_p5 = por %p1141_p6, %p1140_p9 }
  0x23   : > { %p1136_p11 = pneg %p1135_p8 }
  0x25   : > { %p1143_p10 = pnand %p1142_p5, %p1136_p11 }
  0x27   : > { %1146 = shalt.err (!%p1143_p10)
}
  0x28   : > { %s1216_s26 = smov 128   ;;  %s1217_s28 = smov 8  }
  0x29   : > { %1056 = dma.hbm_to_vmem [thread:$0]  (!%p1318_p12), %s1462_s4, 1024, %s208_s11, [#allocation3], %s1216_s26, %s1216_s26, %s1217_s28  }
  0x2a   : > { %p1472_p13 = scmp.ne.s32.totalorder %s1470_s9, 0 }
  0x2b   : > { %p1473_p1 = scmp.eq.s32.totalorder (!%p1472_p13), %s1282_s25, 0 }
  0x2c   : > { %247 = sbr.rel (%p1472_p13) target bundleno = 973 (0x3cd), region = 44 }
  0x33   : > { %1192 = dma.done.wait (%p1473_p1), [#allocation3], 1024   ;;  %p1474_p0 = pmov %p1473_p1 }
  0x34   : > { %p284_p5 = scmp.lt.s32.totalorder %s1282_s25, 1  ;;  %v1218_v0 = vmov 7   ;;  %v1219_v1 = vmov 6   ;;  %vm355_vm0 = vcmask 1045504   ;;  %vm346_vm1 = vcmask 48128   ;;  %v317_v3 = vld [vmem:[%s1461_s3] sm:$0xff] }
  0x35   : > { %1194 = vsyncadd (%p1474_p0), [#allocation3], 4294966272  ;;  %1107 = vset.pattern.permute.xlu1 %v1218_v0  ;;  %1106 = vset.pattern.permute.xlu0 %v1219_v1  ;;  %v318_v4 = vld [vmem:[%s1461_s3 + $0x8] sm:$0xff]  ;;  %v319_v5 = vld [vmem:[%s1461_s3 + $0x10] sm:$0xff]  ;;  %v1220_v7 = vmov 8   ;;  %vm516_vm2 = vcmask 261120  }
  0x36   : > { %s1346_s13 = scalar_select %p284_p5, %s1282_s25, 1  ;;  %980 = vmatprep.mubr.msk.f32.mxu0 %vm346_vm1, %v317_v3  ;;  %445 = vperm.xlu1 %1107, %v317_v3   ;;  %v320_v6 = vld [vmem:[%s1461_s3 + $0x18] sm:$0xff]  ;;  %v492_v8 = vld [vmem:[#allocation2] sm:$0xff]  ;;  %v1365_v9 = vld [vmem:[#allocation2 + $0x8] sm:$0xff]  ;;  %v1221_v10 = vmov 32   ;;  %vm300_vm3 = vcmask 1042432  }
  0x37   : > { %324 = vperm.xlu0 %1106, %v317_v3   ;;  %994 = vmatprep.mubr.msk.f32.mxu1 %vm516_vm2, %v492_v8  ;;  %v615_v11 = vld [vmem:[#allocation2 + $0x20] sm:$0xff]  ;;  %v1369_v12 = vld [vmem:[#allocation2 + $0x10] sm:$0xff]  ;;  %v1371_v13 = vld [vmem:[#allocation2 + $0x18] sm:$0xff]  ;;  %vm1223_vm6 = vmmov 0   ;;  %s949_s19 = sshll.u32 %s1282_s25, 6  ;;  %p1475_p9 = scmp.ne.s32.totalorder %s1468_s7, 0 }
  0x38   : > { %s931_s11 = sshll.u32 %s1346_s13, 3  ;;  %v1375_v14 = vld [vmem:[#allocation2 + $0x28] sm:$0xff]  ;;  %v1378_v15 = vld [vmem:[#allocation2 + $0x30] sm:$0xff]  ;;  %v1380_v16 = vld [vmem:[#allocation2 + $0x38] sm:$0xff]  ;;  %s1416_s10 = scalar_lea.hbm %s1464_s6, %s949_s19 }
  0x39   : > { %s287_s14 = scalar_lea.vmem %s1458_s0, %s931_s11  ;;  %v1387_v17 = vld [vmem:[%s1463_s5] sm:$0xf]  ;;  %s932_s11 = sshll.u32 %s1346_s13, 2 }
  0x3a   : > { %v321_v2 = vld [vmem:[%s287_s14] sm:$0x3f]  ;;  %449 = vperm.xlu1 %1107, %v318_v4   ;;  %s291_s14 = scalar_lea.vmem %s1459_s1, %s932_s11  ;;  %s295_s17 = scalar_lea.vmem %s1460_s2, %s932_s11 }
  0x3b   : > { %978 = vmatprep.subr.msk.mxu0 %vm355_vm0, %v321_v2  ;;  %329 = vperm.xlu0 %1106, %v318_v4   ;;  %v296_v18 = vld [vmem:[%s291_s14] sm:$0x7]  ;;  %s281_s13 = sand.u32 1, %s1205_s22   ;;  %s1225_s25 = smov [#allocation5]  }
  0x3c   : > { %979 = vmatpush3.msk.msra.mxu0 %vm355_vm0, %v321_v2  ;;  %v297_v19 = vld [vmem:[%s295_s17] sm:$0x7]  ;;  %s930_s18 = sshll.u32 %s281_s13, 2  ;;  %s816_s11 = scalar_lea.sflag [#allocation4], %s281_s13 }
  0x3d   : > { %981 = vmatmul.mubr.msk.f32.vlgmr.msra.gmra.mrb[0].mxu0 %vm346_vm1, %v318_v4  ;;  %v298_v20 = vsub.f32 %v296_v18, %v297_v19  ;;  %s283_s20 = scalar_lea.vmem [#allocation5], %s930_s18  ;;  %s1151_s9 = sshll.u32 %s1225_s25, 4  ;;  %s1152_s9 = int_to_ptr.vmem [resolvable:$false] %s1151_s9 }
  0x3e   : > { %983 = vmatprep.mubr.msk.f32.mxu0 %vm346_vm1, %v319_v5  ;;  %1108 = vset.pattern.permute.xlu1 %v1219_v1  ;;  %s829_s26 = sshll.u32 %s283_s20, 4  ;;  %s1153_s14 = scalar_lea.vmem %s1152_s9, 128  ;;  %s1418_s26 = int_to_ptr.vmem [resolvable:$true] %s829_s26 }
  0x3f   : > { %339 = vperm.xlu1 %1108, %v320_v6   ;;  %334 = vperm.xlu0 %1106, %v319_v5   ;;  %v299_v21 = vmul.f32 %v298_v20, %v298_v20  ;;  %s1147_s12 = scalar_lea.vmem %s1418_s26, 64  ;;  %p1154_p2 = scmp.lt.s32.totalorder %s1418_s26, %s1152_s9 }
  0x40   : > { %p1148_p6 = scmp.ne.s32.totalorder %s1418_s26, %s1147_s12  ;;  %p1155_p3 = scmp.lt.s32.totalorder %s1153_s14, %s1147_s12 }
  0x41   : > { %984 = vmatmul.mubr.msk.f32.gmra.mrb[2].mxu0 %vm346_vm1, %v320_v6  ;;  %v301_v22 = vsel %vm300_vm3, %v299_v21, 0.0 }
  0x42   : > { %1008 = vmatprep.mubr.msk.f32.mxu0 %vm516_vm2, %v615_v11  ;;  %v302_v23 = vrot.slane %v301_v22, 4  ;;  %p1149_p10 = pnand %p1148_p6, %p1475_p9  ;;  %p1156_p4 = por %p1155_p3, %p1154_p2 }
  0x43   : > { %1110 = vset.pattern.permute.xlu1 %v1218_v0  ;;  %1109 = vset.pattern.permute.xlu0 %v1218_v0 }
  0x44   : > { %457 = vperm.xlu1 %1110, %v320_v6   ;;  %453 = vperm.xlu0 %1109, %v319_v5   ;;  %v303_v24 = vadd.f32 %v302_v23, %v301_v22  ;;  %p1150_p12 = pneg %p1149_p10 }
  0x46   : > { %v304_v25 = vrot.slane %v303_v24, 2  ;;  %p1157_p7 = pnand %p1156_p4, %p1150_p12 }
  0x48   : > { %1111 = vset.pattern.permute.xlu1 %v1220_v7  ;;  %1112 = vset.pattern.permute.xlu0 %v1220_v7  ;;  %v305_v26 = vadd.f32 %v304_v25, %v303_v24 }
  0x49   : > { %469 = vperm.xlu1 %1111, %v317_v3   ;;  %473 = vperm.xlu0 %1112, %v318_v4  }
  0x4a   : > { %v306_v27 = vrot.slane %v305_v26, 1 }
  0x4c   : > { %v307_v28 = vadd.f32 %v306_v27, %v305_v26 }
  0x4d   : > { %477 = vperm.xlu1 %1111, %v319_v5   ;;  %1113 = vset.pattern.permute.xlu0 %v1221_v10 }
  0x4e   : > { %498 = vperm.xlu0 %1113, %v492_v8   ;;  %1115 = vrsqrt.f32 %v307_v28  ;;  %vm310_vm4 = vcmp.eq.f32.partialorder %v307_v28, inf  ;;  %v313_v34 = vand.u32 2147483648, %v307_v28  ;;  %vm312_vm5 = vcmp.eq.f32.partialorder %v307_v28, 0.0 }
  0x51   : > { %481 = vperm.xlu1 %1111, %v320_v6  }
  0x52   : > { %513 = vperm.xlu0 %1113, %v1371_v13  }
  0x55   : > { %1114 = vset.pattern.permute.xlu1 %v1221_v10 }
  0x56   : > { %503 = vperm.xlu1 %1114, %v1365_v9   ;;  %626 = vperm.xlu0 %1113, %v1375_v14  }
  0x58   : > { %v1116_v30 = vpop.eup %1115 }
  0x59   : > { %v309_v31 = vmul.f32 %v1116_v30, %v307_v28 }
  0x5a   : > { %508 = vperm.xlu1 %1114, %v1369_v12   ;;  %636 = vperm.xlu0 %1113, %v1380_v16  }
  0x5b   : > { %v311_v35 = vsel %vm310_vm4, %v307_v28, %v309_v31 }
  0x5c   : > { %v314_v37 = vsel %vm312_vm5, %v313_v34, %v311_v35  ;;  %v1222_v35 = vmov 0.0|0.0  }
  0x5d   : > { %1117 = vrcp.f32 %v314_v37 }
  0x5e   : > { %621 = vperm.xlu1 %1114, %v615_v11  }
  0x62   : > { %631 = vperm.xlu1 %1114, %v1378_v15  }
  0x66   : > { %739 = vperm.xlu1 %1114, %v1387_v17  }
  0x67   : > { %v1118_v43 = vpop.eup %1117 }
  0xb5   : > { %v446_v29 = vpop.permute.xlu1 %445 }
  0xb6   : > { %v325_v33 = vpop.permute.xlu0 %324  ;;  %v460_v50 = vmul.f32 %v1118_v43, %v446_v29 }
  0xb7   : > { %v342_v45 = vmul.f32 %v325_v33, %v314_v37 }
  0xb9   : > { %v450_v32 = vpop.permute.xlu1 %449 }
  0xba   : > { %v330_v38 = vpop.permute.xlu0 %329  ;;  %v461_v47 = vmul.f32 %v1118_v43, %v450_v32 }
  0xbb   : > { %v343_v44 = vmul.f32 %v330_v38, %v314_v37 }
  0xbe   : > { %v340_v36 = vpop.permute.xlu1 %339  ;;  %v335_v40 = vpop.permute.xlu0 %334 }
  0xbf   : > { %v345_v54 = vmul.f32 %v340_v36, %v314_v37  ;;  %v344_v56 = vmul.f32 %v335_v40, %v314_v37  ;;  %v1224_v36 = vmov 0.0  }
  0xc3   : > { %v458_v39 = vpop.permute.xlu1 %457  ;;  %v454_v42 = vpop.permute.xlu0 %453 }
  0xc4   : > { %v463_v59 = vmul.f32 %v1118_v43, %v458_v39  ;;  %v462_v63 = vmul.f32 %v1118_v43, %v454_v42 }
  0xc8   : > { %v470_v41 = vpop.permute.xlu1 %469  ;;  %v474_v53 = vpop.permute.xlu0 %473 }
  0xcc   : > { %v478_v51 = vpop.permute.xlu1 %477 }
  0xcd   : > { %v499_v20 = vpop.permute.xlu0 %498 }
  0xd0   : > { %v482_v4 = vpop.permute.xlu1 %481 }
  0xd1   : > { %v514_v27 = vpop.permute.xlu0 %513 }
  0xd5   : > { %v504_v21 = vpop.permute.xlu1 %503  ;;  %v627_v37 = vpop.permute.xlu0 %626 }
  0xd9   : > { %v509_v30 = vpop.permute.xlu1 %508 }
  0xdd   : > { %v622_v38 = vpop.permute.xlu1 %621 }
 0x110   : > { %v982_v46 = vpop.f32.mrb[0].mxu0 }
 0x111   : > { %v431_v48 = vadd.f32 %v982_v46, %v343_v44  ;;  %v425_v49 = vpop.f32.mrb[1].mxu0 }
 0x112   : > { %v426_v52 = vadd.f32 %v425_v49, %v342_v45  ;;  %v632_v45 = vpop.permute.xlu1 %631 }
 0x113   : > { %v465_v55 = vadd.f32 %v461_v47, %v431_v48 }
 0x114   : > { %v464_v57 = vadd.f32 %v460_v50, %v426_v52  ;;  %v985_v58 = vpop.f32.mrb[2].mxu0 }
 0x115   : > { %v485_v60 = vadd.f32 %v474_v53, %v465_v55  ;;  %v441_v61 = vadd.f32 %v985_v58, %v345_v54  ;;  %v435_v62 = vpop.f32.mrb[3].mxu0 }
 0x116   : > { %v436_v0 = vadd.f32 %v435_v62, %v344_v56  ;;  %v484_v1 = vadd.f32 %v470_v41, %v464_v57  ;;  %v740_v52 = vpop.permute.xlu1 %739 }
 0x117   : > { %v489_v2 = vmax.f32 %v485_v60, 0.0  ;;  %v467_v3 = vadd.f32 %v463_v59, %v441_v61 }
 0x118   : > { %v466_v5 = vadd.f32 %v462_v63, %v436_v0  ;;  %v488_v6 = vmax.f32 %v484_v1, 0.0 }
 0x119   : > { %v487_v7 = vadd.f32 %v482_v4, %v467_v3 }
 0x11a   : > { %v486_v8 = vadd.f32 %v478_v51, %v466_v5  ;;  %v1025_v10 = vpack.c.bf16 %v489_v2, %v488_v6 }
 0x11b   : > { %v491_v11 = vmax.f32 %v487_v7, 0.0 }
 0x11c   : > { %v490_v18 = vmax.f32 %v486_v8, 0.0  ;;  %1026 = vmatprep.subr.bf16.mxu1 %v1025_v10 }
 0x11d   : > { %1028 = vmatpush3.bf16.msra.mxu1 %v1025_v10 }
 0x11e   : > { %v1029_v19 = vpack.c.bf16 %v491_v11, %v490_v18 }
 0x120   : > { %1030 = vmatprep.subr.bf16.mxu1 %v1029_v19 }
 0x121   : > { %1032 = vmatpush3.bf16.msra.mxu1 %v1029_v19 }
 0x122   : > { %1041 = vmatprep.subr.bf16.mxu1 %v1222_v35 }
 0x124   : > { %995 = vmatmul.mubr.msk.f32.vlgmr.msra.gmra.mrb[0].mxu1 %vm516_vm2, %v1365_v9 }
 0x125   : > { %997 = vmatprep.mubr.msk.f32.mxu1 %vm516_vm2, %v1369_v12 }
 0x128   : > { %998 = vmatmul.mubr.msk.f32.gmra.mrb[2].mxu1 %vm516_vm2, %v1371_v13 }
 0x129   : > { %1022 = vmatprep.mubr.msk.f32.mxu1 %vm1223_vm6, %v1224_v36 }
 0x1f7   : > { %v996_v22 = vpop.f32.mrb[0].mxu1 }
 0x1f8   : > { %v597_v23 = vadd.f32 %v996_v22, %v504_v21  ;;  %v591_v24 = vpop.f32.mrb[1].mxu1 }
 0x1f9   : > { %v592_v25 = vadd.f32 %v591_v24, %v499_v20 }
 0x1fa   : > { %v611_v26 = vmax.f32 %v597_v23, 0.0 }
 0x1fb   : > { %v610_v28 = vmax.f32 %v592_v25, 0.0  ;;  %v999_v29 = vpop.f32.mrb[2].mxu1 }
 0x1fc   : > { %v607_v31 = vadd.f32 %v999_v29, %v514_v27  ;;  %v601_v32 = vpop.f32.mrb[3].mxu1 }
 0x1fd   : > { %v1033_v9 = vpack.c.bf16 %v611_v26, %v610_v28  ;;  %v602_v33 = vadd.f32 %v601_v32, %v509_v30 }
 0x1fe   : > { %v613_v34 = vmax.f32 %v607_v31, 0.0 }
 0x1ff   : > { %v612_v12 = vmax.f32 %v602_v33, 0.0  ;;  %1034 = vmatprep.subr.bf16.mxu0 %v1033_v9 }
 0x200   : > { %1036 = vmatpush3.bf16.msra.mxu0 %v1033_v9 }
 0x201   : > { %v1037_v13 = vpack.c.bf16 %v613_v34, %v612_v12 }
 0x203   : > { %1038 = vmatprep.subr.bf16.mxu0 %v1037_v13 }
 0x204   : > { %1040 = vmatpush3.bf16.msra.mxu0 %v1037_v13 }
 0x207   : > { %1009 = vmatmul.mubr.msk.f32.vlgmr.msra.gmra.mrb[4].mxu0 %vm516_vm2, %v1375_v14  ;;  %v637_v14 = vpop.permute.xlu0 %636 }
 0x208   : > { %1011 = vmatprep.mubr.msk.f32.mxu0 %vm516_vm2, %v1378_v15 }
 0x20b   : > { %1012 = vmatmul.mubr.msk.f32.gmra.mrb[6].mxu0 %vm516_vm2, %v1380_v16 }
 0x2da   : > { %v1010_v39 = vpop.f32.mrb[4].mxu0 }
 0x2db   : > { %v719_v40 = vadd.f32 %v1010_v39, %v627_v37  ;;  %v713_v41 = vpop.f32.mrb[5].mxu0 }
 0x2dc   : > { %v714_v42 = vadd.f32 %v713_v41, %v622_v38 }
 0x2dd   : > { %v733_v43 = vmax.f32 %v719_v40, 0.0 }
 0x2de   : > { %v732_v44 = vmax.f32 %v714_v42, 0.0  ;;  %v1013_v15 = vpop.f32.mrb[6].mxu0 }
 0x2df   : > { %v729_v46 = vadd.f32 %v1013_v15, %v637_v14  ;;  %v723_v16 = vpop.f32.mrb[7].mxu0 }
 0x2e0   : > { %v1042_v47 = vpack.c.bf16 %v733_v43, %v732_v44  ;;  %v724_v48 = vadd.f32 %v723_v16, %v632_v45 }
 0x2e1   : > { %v735_v49 = vmax.f32 %v729_v46, 0.0 }
 0x2e2   : > { %v734_v50 = vmax.f32 %v724_v48, 0.0  ;;  %1043 = vmatpush3.bf16.msra.mxu1 %v1042_v47 }
 0x2e3   : > { %1044 = vmatprep.subr.bf16.mxu1 %v1222_v35 }
 0x2e4   : > { %v1045_v51 = vpack.c.bf16 %v735_v49, %v734_v50 }
 0x2e6   : > { %1046 = vmatpush3.bf16.msra.mxu1 %v1045_v51 }
 0x2e9   : > { %1023 = vmatmul.mubr.msk.f32.vlgmr.msra.gmra.mrb[4].mxu1 %vm516_vm2, %v1387_v17 }
 0x3bc   : > { %v810_v53 = vpop.f32.mrb[4].mxu1 }
 0x3bd   : > { %v811_v54 = vadd.f32 %v810_v53, %v740_v52  ;;  %v1024_v55 = vpop.f32.mrb[5].mxu1 }
 0x3bf   : > { %814 = vst [vmem:[%s283_s20] sm:$0xf] %v811_v54 }
 0x3c0   : > { %1160 = shalt.err (!%p1157_p7)
}
 0x3c1   : > { %s1161_s15 = scalar_lea.hbm %s1416_s10, 64  ;;  %s1165_s13 = scalar_lea.hbm %s1464_s6, 128 }
 0x3c2   : > { %p1162_p8 = scmp.ne.s32.totalorder %s1416_s10, %s1161_s15  ;;  %p1166_p1 = scmp.lt.u32.totalorder %s1416_s10, %s1464_s6 }
 0x3c3   : > { %p1167_p0 = scmp.lt.u32.totalorder %s1165_s13, %s1161_s15  ;;  %p1169_p6 = scmp.lt.u32.totalorder %s1161_s15, %s1416_s10 }
 0x3c4   : > { %p1163_p11 = pnand %p1162_p8, %p1475_p9 }
 0x3c5   : > { %p1168_p5 = por %p1167_p0, %p1166_p1 }
 0x3c6   : > { %p1164_p13 = pneg %p1163_p11 }
 0x3c7   : > { %p1170_p10 = por %p1169_p6, %p1168_p5 }
 0x3c9   : > { %p1171_p12 = pnand %p1170_p10, %p1164_p13 }
 0x3cb   : > { %1174 = shalt.err (!%p1171_p12)
}
 0x3cc   : > { %1051 = dma.vmem_to_hbm [thread:$0]  (%p1475_p9), %s1418_s26, 64, %s1416_s10, %s816_s11  }
 0x3cd PF: > { %p1063_p2 = scmp.ge.s32.totalorder %s1213_s24, 2  ;;  %s841_s20 = sand.u32 1, %s1201_s21  }
 0x3ce   : > { %p1476_p3 = scmp.ne.s32.totalorder %s1469_s8, 0  ;;  %s842_s28 = scalar_lea.sflag [#allocation4], %s841_s20 }
 0x3d0   : > { %p1058_p4 = pnand %p1063_p2, %p1476_p3 }
 0x3d2   : > { %1196 = dma.done.wait (!%p1058_p4), %s842_s28, 64  }
 0x3d3   : > { %1198 = vsyncadd (!%p1058_p4), %s842_s28, 4294967232  ;;  %p17_p7 = scmp.ge.s32.totalorder %s1286_s27, 4   ;;  %s1477_s21 = smov %s1205_s22 }
 0x3d4   : > { %s1478_s22 = smov %s1209_s23  ;;  %s1479_s23 = smov %s1297_s30 }
 0x3d5   : > { %s1480_s24 = smov %s1286_s27  ;;  %19 = sbr.rel (!%p17_p7) target bundleno = 4 (0x4), region = 91 }
 0x3dc   :  { %847 = vsyncpa [#allocation3], 1 }
 0x3dd   :  { %849 = vsyncpa [#allocation3 + $0x1], 1 }
 0x3de   :  { %850 = vsyncpa [#allocation4], 1 }
 0x3df   :  { %852 = vsyncpa [#allocation4 + $0x1], 1 }

</bundles_post_ra>
